<compile_context>
chip_gen: v5e
topology: v5e:2x2
jax: 0.10.0
libtpu: 0.0.40
codegen_flags: <defaults>
</compile_context>

<pallas_src>
import math

import jax
import jax.numpy as jnp
from jax.experimental import pallas as pl
from jax.experimental.pallas import tpu as pltpu

BN_EPS = 1e-5
TILE_M_CAP = 512                 # 512 reaches ~85% of HBM roofline (vs ~63% @ 256)
NSPLIT = 2                       # stats partials per TensorCore (v7x megacore)
STATS_ROWS = 8                   # per-core stats block is (8, C): sublane-aligned
VMEM_LIMIT = 48 * 1024 * 1024    # explicit scoped-VMEM budget (fits v7x's 64 MiB)


def _cdiv(a, b):
    return -(-a // b)


def _round_up(a, b):
    return (a + b - 1) // b * b


def _pick_tile(m):
    tm = min(TILE_M_CAP, _round_up(max(_cdiv(m, NSPLIT), 1), 8))
    return max(8, tm)


# ----------------------------------------------------------------------------
# Pallas kernels
# ----------------------------------------------------------------------------
def _make_stream_conv_kernel(deltas, tm, has_mask, has_bias, has_stats, relu):
    """Streamed 3x3/s1 conv on flattened padded base rows.

    Inputs per grid step: two consecutive (TM, Cin) row blocks of the flattened
    padded activation (current + halo), optional (TM, 9) mask logits, the
    (9*Cin, Cout) weight, optional bias, optional validity column.  The 9 taps
    are static row-shifted slices of the contiguous 2*TM window; they are
    gated (input side) and lane-concatenated into one K = 9*Cin MXU dot."""

    def kernel(*refs):
        idx = 0
        a_ref = refs[idx]; idx += 1            # (TM, Cin) bf16, rows [r0, r0+TM)
        b_ref = refs[idx]; idx += 1            # (TM, Cin) bf16, rows [r0+TM, r0+2TM)
        mask_ref = None
        if has_mask:
            mask_ref = refs[idx]; idx += 1     # (TM, 9) f32 logits
        w_ref = refs[idx]; idx += 1            # (9*Cin, Cout) bf16
        bias_ref = None
        if has_bias:
            bias_ref = refs[idx]; idx += 1     # (1, Cout) f32
        valid_ref = None
        if has_stats:
            valid_ref = refs[idx]; idx += 1    # (TM, 1) f32 0/1
        y_ref = refs[idx]; idx += 1            # (TM, Cout)
        sum_ref = sq_ref = None
        if has_stats:
            sum_ref = refs[idx]; idx += 1      # (8, Cout) f32, resident over M axis
            sq_ref = refs[idx]; idx += 1       # (8, Cout) f32, resident over M axis

        # contiguous window of flattened padded rows; taps = constant offsets.
        win = jnp.concatenate([a_ref[...], b_ref[...]], axis=0)       # (2TM, Cin)
        gate = None
        if has_mask:
            # sigmoid of only 9 logits per row (EUP); gate applied in bf16.
            gate = jax.nn.sigmoid(mask_ref[...].astype(jnp.float32)
                                  ).astype(jnp.bfloat16)              # (TM, 9)

        parts = []
        for t, d in enumerate(deltas):
            xt = win[d:d + tm]                                        # (TM, Cin)
            if has_mask:
                xt = xt * gate[:, t:t + 1]    # input-side modulation gate
            parts.append(xt)
        xk = jnp.concatenate(parts, axis=-1)                          # (TM, 9*Cin)
        acc = jnp.dot(xk, w_ref[...], preferred_element_type=jnp.float32)

        if has_bias:
            acc = acc + bias_ref[...]
        if relu:
            acc = jnp.maximum(acc, 0.0)
        y_ref[...] = acc.astype(y_ref.dtype)

        if has_stats:
            @pl.when(pl.program_id(1) == 0)
            def _():
                sum_ref[...] = jnp.zeros_like(sum_ref)
                sq_ref[...] = jnp.zeros_like(sq_ref)

            av = acc * valid_ref[...]          # zero out pad / garbage rows
            sum_ref[...] += jnp.sum(av, axis=0, keepdims=True)
            sq_ref[...] += jnp.sum(av * acc, axis=0, keepdims=True)

    return kernel


def _im2col_conv_kernel(x_ref, w_ref, y_ref, sum_ref, sq_ref):
    """Generic conv (7x7-s2 stem, 3x3-s2, 1x1 downsample): one flattened MXU
    dot per M tile + resident per-channel sum / sumsq (BN always follows)."""
    acc = jnp.dot(x_ref[...], w_ref[...], preferred_element_type=jnp.float32)
    y_ref[...] = acc.astype(y_ref.dtype)

    @pl.when(pl.program_id(1) == 0)
    def _():
        sum_ref[...] = jnp.zeros_like(sum_ref)
        sq_ref[...] = jnp.zeros_like(sq_ref)

    sum_ref[...] += jnp.sum(acc, axis=0, keepdims=True)
    sq_ref[...] += jnp.sum(acc * acc, axis=0, keepdims=True)


def _make_bn_apply_kernel(has_res, relu):
    """Pass 2: y(bf16) * scale + shift [+ residual] [-> ReLU], f32 math."""

    def kernel(*refs):
        idx = 0
        y = refs[idx][...].astype(jnp.float32); idx += 1
        scale = refs[idx][...]; idx += 1
        shift = refs[idx][...]; idx += 1
        out = y * scale + shift
        if has_res:
            out = out + refs[idx][...].astype(jnp.float32); idx += 1
        if relu:
            out = jnp.maximum(out, 0.0)
        refs[idx][...] = out.astype(refs[idx].dtype)

    return kernel


def _make_maxpool_kernel(deltas, tm):
    def kernel(a_ref, b_ref, o_ref):
        win = jnp.concatenate([a_ref[...], b_ref[...]], axis=0)
        out = win[deltas[0]:deltas[0] + tm]
        for d in deltas[1:]:
            out = jnp.maximum(out, win[d:d + tm])
        o_ref[...] = out
    return kernel


# ----------------------------------------------------------------------------
# pallas_call wrappers
# ----------------------------------------------------------------------------
def _bn_apply(y, scale, shift, tm, *, residual=None, relu=False):
    m_pad, cout = y.shape
    inputs = [y, scale.reshape(1, cout).astype(jnp.float32),
              shift.reshape(1, cout).astype(jnp.float32)]
    in_specs = [pl.BlockSpec((tm, cout), lambda i: (i, 0)),
                pl.BlockSpec((1, cout), lambda i: (0, 0)),
                pl.BlockSpec((1, cout), lambda i: (0, 0))]
    if residual is not None:
        inputs.append(residual)
        in_specs.append(pl.BlockSpec((tm, cout), lambda i: (i, 0)))
    return pl.pallas_call(
        _make_bn_apply_kernel(residual is not None, relu),
        grid=(m_pad // tm,),
        in_specs=in_specs,
        out_specs=pl.BlockSpec((tm, cout), lambda i: (i, 0)),
        out_shape=jax.ShapeDtypeStruct((m_pad, cout), jnp.float32),
        compiler_params=pltpu.CompilerParams(
            dimension_semantics=("parallel",), vmem_limit_bytes=VMEM_LIMIT),
    )(*inputs)


def _finish_bn(y, ssum_raw, ssq_raw, count, gamma, beta, tm,
               residual_flat, relu):
    # Each core's partial lives in rows [c*8, (c+1)*8) (all 8 rows identical).
    ssum = ssum_raw[::STATS_ROWS].sum(axis=0)
    ssq = ssq_raw[::STATS_ROWS].sum(axis=0)
    mean = ssum / count
    # TODO(synk): E[x^2]-E[x]^2 can cancel for channels with large means; a
    # shifted / Welford-style accumulation would be more robust.
    var = jnp.maximum(ssq / count - mean * mean, 0.0)
    scale = gamma * jax.lax.rsqrt(var + BN_EPS)
    shift = beta - mean * scale
    return _bn_apply(y, scale, shift, tm, residual=residual_flat, relu=relu)


def _conv3x3_s1(x_nhwc, w_hwio, *, mask_flat=None, bias=None, gamma=None,
                beta=None, residual=None, relu=False, return_flat=False):
    """Streamed 3x3 / stride-1 / pad-1 conv (+ optional modulation mask,
    bias, train-mode BN, residual, ReLU).  Computes outputs at *all* padded
    base positions (invalid rows are dropped afterwards and masked out of the
    BN statistics) so that all 9 taps are contiguous row offsets."""
    n, h, w, cin = x_nhwc.shape
    cout = w_hwio.shape[-1]
    hp, wp = h + 2, w + 2
    r = n * hp * wp
    deltas = [i * wp + j for i in range(3) for j in range(3)]

    xflat = jnp.pad(x_nhwc, ((0, 0), (1, 1), (1, 1), (0, 0))).reshape(r, cin)

    tm = max(_round_up(deltas[-1], 8), _pick_tile(r))   # need TM >= max tap offset
    tps = _cdiv(r, NSPLIT * tm)                         # tiles per core-split
    r_pad = NSPLIT * tps * tm
    r_alloc = r_pad + tm                                # +1 halo block for last tile
    xflat = jnp.pad(xflat, ((0, r_alloc - r), (0, 0))).astype(jnp.bfloat16)
    w_flat = w_hwio.reshape(9 * cin, cout).astype(jnp.bfloat16)

    has_mask = mask_flat is not None
    has_bias = bias is not None
    has_bn = gamma is not None

    inputs = [xflat, xflat]
    in_specs = [pl.BlockSpec((tm, cin), lambda c, i: (c * tps + i, 0)),
                pl.BlockSpec((tm, cin), lambda c, i: (c * tps + i + 1, 0))]
    if has_mask:
        assert mask_flat.shape[0] == r
        mflat = jnp.pad(mask_flat.astype(jnp.float32),
                        ((0, r_pad - r), (0, 0)))
        inputs.append(mflat)
        in_specs.append(pl.BlockSpec((tm, 9), lambda c, i: (c * tps + i, 0)))
    inputs.append(w_flat)
    in_specs.append(pl.BlockSpec((9 * cin, cout), lambda c, i: (0, 0)))
    if has_bias:
        inputs.append(bias.reshape(1, cout).astype(jnp.float32))
        in_specs.append(pl.BlockSpec((1, cout), lambda c, i: (0, 0)))
    if has_bn:
        valid = jnp.pad(jnp.ones((n, h, w, 1), jnp.float32),
                        ((0, 0), (1, 1), (1, 1), (0, 0))).reshape(r, 1)
        valid = jnp.pad(valid, ((0, r_pad - r), (0, 0)))
        inputs.append(valid)
        in_specs.append(pl.BlockSpec((tm, 1), lambda c, i: (c * tps + i, 0)))

    y_dtype = jnp.bfloat16 if has_bn else jnp.float32   # bf16 inter-pass round trip
    y_shape = jax.ShapeDtypeStruct((r_pad, cout), y_dtype)
    y_spec = pl.BlockSpec((tm, cout), lambda c, i: (c * tps + i, 0))
    if has_bn:
        out_shape = (y_shape,
                     jax.ShapeDtypeStruct((NSPLIT * STATS_ROWS, cout), jnp.float32),
                     jax.ShapeDtypeStruct((NSPLIT * STATS_ROWS, cout), jnp.float32))
        out_specs = (y_spec,
                     pl.BlockSpec((STATS_ROWS, cout), lambda c, i: (c, 0)),
                     pl.BlockSpec((STATS_ROWS, cout), lambda c, i: (c, 0)))
        sem = ("parallel", "arbitrary")   # per-core stats accumulator over M
    else:
        out_shape = y_shape
        out_specs = y_spec
        sem = ("parallel", "parallel")

    kernel = _make_stream_conv_kernel(deltas, tm, has_mask, has_bias, has_bn,
                                      relu and not has_bn)
    flops = 2 * r_pad * 9 * cin * cout
    bytes_accessed = (2 * r_alloc * cin * 2 + 9 * cin * cout * 2
                      + r_pad * cout * (2 if has_bn else 4)
                      + (r_pad * 9 * 4 if has_mask else 0))
    out = pl.pallas_call(
        kernel,
        grid=(NSPLIT, tps),
        in_specs=in_specs,
        out_specs=out_specs,
        out_shape=out_shape,
        compiler_params=pltpu.CompilerParams(
            dimension_semantics=sem, vmem_limit_bytes=VMEM_LIMIT),
        cost_estimate=pl.CostEstimate(
            flops=int(flops),
            transcendentals=int(r_pad * 9) if has_mask else 0,
            bytes_accessed=int(bytes_accessed)),
    )(*inputs)

    if has_bn:
        y, ssum, ssq = out
        res_flat = None
        if residual is not None:
            res_flat = jnp.pad(residual,
                               ((0, 0), (1, 1), (1, 1), (0, 0))).reshape(r, cout)
            res_flat = jnp.pad(res_flat, ((0, r_pad - r), (0, 0)))
        y = _finish_bn(y, ssum, ssq, jnp.float32(n * h * w),
                       gamma, beta, tm, res_flat, relu)
    else:
        y = out

    y = y[:r]
    if return_flat:
        return y                                       # flat padded-base layout
    return y.reshape(n, hp, wp, cout)[:, :h, :w, :]


def _extract_taps(x, kh, kw, stride, pad):
    """x: (N,H,W,C) -> list of kh*kw tap matrices, each (N*Hout*Wout, C)."""
    n, h, w, c = x.shape
    xp = jnp.pad(x, ((0, 0), (pad, pad), (pad, pad), (0, 0)))
    hout = (h + 2 * pad - kh) // stride + 1
    wout = (w + 2 * pad - kw) // stride + 1
    taps = []
    for i in range(kh):
        for j in range(kw):
            sl = xp[:, i:i + (hout - 1) * stride + 1:stride,
                    j:j + (wout - 1) * stride + 1:stride, :]
            taps.append(sl.reshape(n * hout * wout, c))
    return taps, (n, hout, wout)


def _conv_im2col(x, w_hwio, *, stride, pad, gamma, beta, relu):
    """Generic (stem 7x7-s2, 3x3-s2, 1x1) conv + train-mode BN [+ ReLU]."""
    kh, kw, cin, cout = w_hwio.shape
    taps, (n, hout, wout) = _extract_taps(x, kh, kw, stride, pad)
    m = n * hout * wout
    k = kh * kw * cin
    # TODO(synk): this path still materializes the im2col slab in HBM (only
    # used for the strided / 1x1 convs, a small fraction of total traffic).
    patches = jnp.concatenate(taps, axis=-1).astype(jnp.bfloat16)   # (M, K)
    w_flat = w_hwio.reshape(k, cout).astype(jnp.bfloat16)

    tm = _pick_tile(m)
    tps = _cdiv(m, NSPLIT * tm)
    m_pad = NSPLIT * tps * tm
    if m_pad != m:
        # zero rows contribute 0 to BN sum / sumsq
        patches = jnp.pad(patches, ((0, m_pad - m), (0, 0)))

    out_shape = (jax.ShapeDtypeStruct((m_pad, cout), jnp.bfloat16),
                 jax.ShapeDtypeStruct((NSPLIT * STATS_ROWS, cout), jnp.float32),
                 jax.ShapeDtypeStruct((NSPLIT * STATS_ROWS, cout), jnp.float32))
    out_specs = (pl.BlockSpec((tm, cout), lambda c, i: (c * tps + i, 0)),
                 pl.BlockSpec((STATS_ROWS, cout), lambda c, i: (c, 0)),
                 pl.BlockSpec((STATS_ROWS, cout), lambda c, i: (c, 0)))
    y, ssum, ssq = pl.pallas_call(
        _im2col_conv_kernel,
        grid=(NSPLIT, tps),
        in_specs=[pl.BlockSpec((tm, k), lambda c, i: (c * tps + i, 0)),
                  pl.BlockSpec((k, cout), lambda c, i: (0, 0))],
        out_specs=out_specs,
        out_shape=out_shape,
        compiler_params=pltpu.CompilerParams(
            dimension_semantics=("parallel", "arbitrary"),
            vmem_limit_bytes=VMEM_LIMIT),
        cost_estimate=pl.CostEstimate(
            flops=int(2 * m_pad * k * cout), transcendentals=0,
            bytes_accessed=int(m_pad * k * 2 + k * cout * 2 + m_pad * cout * 2)),
    )(patches, w_flat)

    y = _finish_bn(y, ssum, ssq, jnp.float32(m), gamma, beta, tm, None, relu)
    return y[:m].reshape(n, hout, wout, cout)


def conv2d(x, w_hwio, *, stride=1, pad=0, mask_flat=None, bias=None,
           gamma=None, beta=None, residual=None, relu=False, return_flat=False):
    kh, kw = w_hwio.shape[0], w_hwio.shape[1]
    if kh == 3 and kw == 3 and stride == 1 and pad == 1:
        return _conv3x3_s1(x, w_hwio, mask_flat=mask_flat, bias=bias,
                           gamma=gamma, beta=beta, residual=residual,
                           relu=relu, return_flat=return_flat)
    assert mask_flat is None and bias is None and residual is None
    assert not return_flat and gamma is not None
    return _conv_im2col(x, w_hwio, stride=stride, pad=pad,
                        gamma=gamma, beta=beta, relu=relu)


def maxpool2d(x):
    """3x3 / stride-2 / pad-1 max pool, streamed like the 3x3 convs (outputs
    are computed at all padded base positions and subsampled afterwards)."""
    n, h, w, c = x.shape
    hp, wp = h + 2, w + 2
    hout = (h - 1) // 2 + 1
    wout = (w - 1) // 2 + 1
    r = n * hp * wp
    deltas = [i * wp + j for i in range(3) for j in range(3)]

    xflat = jnp.pad(x, ((0, 0), (1, 1), (1, 1), (0, 0)),
                    constant_values=-jnp.inf).reshape(r, c)
    tm = max(_round_up(deltas[-1], 8), _pick_tile(r))
    tiles = _cdiv(r, tm)
    r_pad = tiles * tm
    r_alloc = r_pad + tm
    xflat = jnp.pad(xflat, ((0, r_alloc - r), (0, 0)),
                    constant_values=-jnp.inf)

    out = pl.pallas_call(
        _make_maxpool_kernel(deltas, tm),
        grid=(tiles,),
        in_specs=[pl.BlockSpec((tm, c), lambda i: (i, 0)),
                  pl.BlockSpec((tm, c), lambda i: (i + 1, 0))],
        out_specs=pl.BlockSpec((tm, c), lambda i: (i, 0)),
        out_shape=jax.ShapeDtypeStruct((r_pad, c), x.dtype),
        compiler_params=pltpu.CompilerParams(
            dimension_semantics=("parallel",), vmem_limit_bytes=VMEM_LIMIT),
    )(xflat, xflat)

    out = out[:r].reshape(n, hp, wp, c)
    return out[:, 0:2 * hout:2, 0:2 * wout:2, :]


# ----------------------------------------------------------------------------
# Parameter init (deterministic, mirrors ResNet.__init__)
# ----------------------------------------------------------------------------
def _init_conv(key, kh, kw, cin, cout):
    n = kh * kw * cout
    std = math.sqrt(2.0 / n)
    return std * jax.random.normal(key, (kh, kw, cin, cout), jnp.float32)


def _init_bn(c):
    return (jnp.ones((c,), jnp.float32), jnp.zeros((c,), jnp.float32))


def init_params(key):
    keys = iter(jax.random.split(key, 64))
    p = {"conv1_w": _init_conv(next(keys), 7, 7, 3, 64), "bn1": _init_bn(64)}
    inplanes = 64
    layer_cfg = [(64, 1, False), (128, 2, True), (256, 2, True), (512, 2, True)]
    layers = []
    for planes, stride, with_dcn in layer_cfg:
        blocks = []
        for b in range(2):
            s = stride if b == 0 else 1
            blk = {
                "stride": s,
                "with_dcn": with_dcn,
                "conv1_w": _init_conv(next(keys), 3, 3, inplanes, planes),
                "bn1": _init_bn(planes),
                "conv2_w": _init_conv(next(keys), 3, 3, planes, planes),
                "bn2": _init_bn(planes),
            }
            if with_dcn:
                # constant_init(conv2_offset, 0): zero weights & bias.  Only
                # the 9 modulation-mask channels are kept (offsets are zero).
                blk["off_mask_w"] = jnp.zeros((3, 3, planes, 9), jnp.float32)
                blk["off_mask_b"] = jnp.zeros((9,), jnp.float32)
            if s != 1 or inplanes != planes:
                blk["ds_w"] = _init_conv(next(keys), 1, 1, inplanes, planes)
                blk["ds_bn"] = _init_bn(planes)
            blocks.append(blk)
            inplanes = planes
        layers.append(blocks)
    p["layers"] = layers
    return p


# ----------------------------------------------------------------------------
# Model forward (deformable_resnet18 backbone)
# ----------------------------------------------------------------------------
def basic_block_forward(x, blk):
    residual = x
    out = conv2d(x, blk["conv1_w"], stride=blk["stride"], pad=1,
                 gamma=blk["bn1"][0], beta=blk["bn1"][1], relu=True)
    if "ds_w" in blk:
        residual = conv2d(x, blk["ds_w"], stride=blk["stride"], pad=0,
                          gamma=blk["ds_bn"][0], beta=blk["ds_bn"][1],
                          relu=False)
    if blk["with_dcn"]:
        # ModulatedDeformConv: conv2_offset is constant-zero initialized, so
        # offsets are identically zero and sampling stays on the regular 3x3
        # grid; only the 9 mask channels are computed (flat padded-base layout
        # so they line up row-for-row with conv2's streamed taps).
        # TODO(synk): bilinear sampling for nonzero offsets not implemented.
        mask_flat = conv2d(out, blk["off_mask_w"], stride=1, pad=1,
                           bias=blk["off_mask_b"], relu=False,
                           return_flat=True)                  # (R, 9) logits
        out = conv2d(out, blk["conv2_w"], stride=1, pad=1,
                     mask_flat=mask_flat,
                     gamma=blk["bn2"][0], beta=blk["bn2"][1],
                     residual=residual, relu=True)
    else:
        out = conv2d(out, blk["conv2_w"], stride=1, pad=1,
                     gamma=blk["bn2"][0], beta=blk["bn2"][1],
                     residual=residual, relu=True)
    return out


def backbone_forward(x_nhwc, params):
    x = conv2d(x_nhwc, params["conv1_w"], stride=2, pad=3,
               gamma=params["bn1"][0], beta=params["bn1"][1], relu=True)
    x = maxpool2d(x)
    feats = []
    for blocks in params["layers"]:
        for blk in blocks:
            x = basic_block_forward(x, blk)
        feats.append(x)
    return tuple(feats)  # (x2, x3, x4, x5)


def basic_model_forward(data_nchw, params):
    """BasicModel.forward: decoder(backbone(data))."""
    x_nhwc = jnp.transpose(data_nchw, (0, 2, 3, 1))
    feats = backbone_forward(x_nhwc, params)
    # TODO(synk): args['decoder'] comes from an unresolved `decoders` module;
    # returning the backbone feature pyramid (in NCHW, like PyTorch) instead.
    return tuple(jnp.transpose(f, (0, 3, 1, 2)) for f in feats)


# ----------------------------------------------------------------------------
if __name__ == "__main__":
    key = jax.random.PRNGKey(0)
    kp, kx = jax.random.split(key)
    params = init_params(kp)
    data = jax.random.normal(kx, (2, 3, 32, 32), jnp.float32)  # NCHW like PyTorch

    feats = basic_model_forward(data, params)
    feats = jax.block_until_ready(feats)

    expected = [(2, 64, 8, 8), (2, 128, 4, 4), (2, 256, 2, 2), (2, 512, 1, 1)]
    assert [tuple(f.shape) for f in feats] == expected, \
        [tuple(f.shape) for f in feats]
    assert all(bool(jnp.all(jnp.isfinite(f))) for f in feats)
    print("KERNEL_OK")
</pallas_src>

<mosaic_0001>
module attributes {stable_mosaic.version = 11 : i64} {
  func.func @_im2col_conv_kernel(%arg0: i32, %arg1: i32, %arg2: memref<256x147xbf16, #tpu.memory_space<vmem>>, %arg3: memref<147x64xbf16, #tpu.memory_space<vmem>>, %arg4: memref<256x64xbf16, #tpu.memory_space<vmem>>, %arg5: memref<8x64xf32, #tpu.memory_space<vmem>>, %arg6: memref<8x64xf32, #tpu.memory_space<vmem>>) attributes {dimension_semantics = [#tpu.dimension_semantics<parallel>, #tpu.dimension_semantics<arbitrary>], iteration_bounds = array<i64: 2, 1>, scalar_prefetch = 0 : i64, scratch_operands = 0 : i64, tpu.core_type = #tpu.core_type<tc>, window_params = [{transform_indices = @transform_0, window_bounds = array<i64: 256, 147>}, {pipeline_mode = #tpu.pipeline_mode<synchronous>, transform_indices = @transform_1, window_bounds = array<i64: 147, 64>}, {transform_indices = @transform_2, window_bounds = array<i64: 256, 64>}, {transform_indices = @transform_3, window_bounds = array<i64: 8, 64>}, {transform_indices = @transform_4, window_bounds = array<i64: 8, 64>}]} {
    %c0 = arith.constant 0 : index
    %c0_0 = arith.constant 0 : index
    %0 = vector.load %arg2[%c0, %c0_0] : memref<256x147xbf16, #tpu.memory_space<vmem>>, vector<256x147xbf16>
    %c0_1 = arith.constant 0 : index
    %c0_2 = arith.constant 0 : index
    %1 = vector.load %arg3[%c0_1, %c0_2] : memref<147x64xbf16, #tpu.memory_space<vmem>>, vector<147x64xbf16>
    %cst = arith.constant dense<0.000000e+00> : vector<256x64xf32>
    %2 = tpu.matmul %0, %1, %cst {dimension_numbers = #tpu.dot_dimension_numbers<[1], [0], [0], [1], [0, 0, 1, 1], [], []>} : vector<256x147xbf16>, vector<147x64xbf16>, vector<256x64xf32> -> vector<256x64xf32>
    %3 = arith.truncf %2 : vector<256x64xf32> to vector<256x64xbf16>
    %c0_3 = arith.constant 0 : index
    %c0_4 = arith.constant 0 : index
    %4 = vector.load %arg4[%c0_3, %c0_4] : memref<256x64xbf16, #tpu.memory_space<vmem>>, vector<256x64xbf16>
    tpu.vector_store %arg4[%c0_3, %c0_4], %3 {strides = array<i32>} : memref<256x64xbf16, #tpu.memory_space<vmem>>, vector<256x64xbf16>,
    %c0_i32 = arith.constant 0 : i32
    %5 = arith.cmpi eq, %arg1, %c0_i32 : i32
    %6 = arith.extui %5 : i1 to i32
    %c0_i32_5 = arith.constant 0 : i32
    %7 = arith.cmpi ne, %6, %c0_i32_5 : i32
    scf.if %7 {
      %cst_16 = arith.constant 0.000000e+00 : f32
      %21 = vector.broadcast %cst_16 : f32 to vector<8x64xf32>
      %c0_17 = arith.constant 0 : index
      %c0_18 = arith.constant 0 : index
      %22 = vector.load %arg5[%c0_17, %c0_18] : memref<8x64xf32, #tpu.memory_space<vmem>>, vector<8x64xf32>
      tpu.vector_store %arg5[%c0_17, %c0_18], %21 {strides = array<i32>} : memref<8x64xf32, #tpu.memory_space<vmem>>, vector<8x64xf32>,
      %cst_19 = arith.constant 0.000000e+00 : f32
      %23 = vector.broadcast %cst_19 : f32 to vector<8x64xf32>
      %c0_20 = arith.constant 0 : index
      %c0_21 = arith.constant 0 : index
      %24 = vector.load %arg6[%c0_20, %c0_21] : memref<8x64xf32, #tpu.memory_space<vmem>>, vector<8x64xf32>
      tpu.vector_store %arg6[%c0_20, %c0_21], %23 {strides = array<i32>} : memref<8x64xf32, #tpu.memory_space<vmem>>, vector<8x64xf32>,
    } else {
    }
    %c0_6 = arith.constant 0 : index
    %c0_7 = arith.constant 0 : index
    %8 = vector.load %arg5[%c0_6, %c0_7] : memref<8x64xf32, #tpu.memory_space<vmem>>, vector<8x64xf32>
    %cst_8 = arith.constant dense<0.000000e+00> : vector<64xf32>
    %9 = vector.multi_reduction <add>, %2, %cst_8 [0] : vector<256x64xf32> to vector<64xf32>
    %10 = vector.shape_cast %9 : vector<64xf32> to vector<1x64xf32>
    %11 = vector.broadcast %10 : vector<1x64xf32> to vector<8x64xf32>
    %12 = arith.addf %8, %11 : vector<8x64xf32>
    %c0_9 = arith.constant 0 : index
    %c0_10 = arith.constant 0 : index
    %13 = vector.load %arg5[%c0_9, %c0_10] : memref<8x64xf32, #tpu.memory_space<vmem>>, vector<8x64xf32>
    tpu.vector_store %arg5[%c0_9, %c0_10], %12 {strides = array<i32>} : memref<8x64xf32, #tpu.memory_space<vmem>>, vector<8x64xf32>,
    %c0_11 = arith.constant 0 : index
    %c0_12 = arith.constant 0 : index
    %14 = vector.load %arg6[%c0_11, %c0_12] : memref<8x64xf32, #tpu.memory_space<vmem>>, vector<8x64xf32>
    %15 = arith.mulf %2, %2 : vector<256x64xf32>
    %cst_13 = arith.constant dense<0.000000e+00> : vector<64xf32>
    %16 = vector.multi_reduction <add>, %15, %cst_13 [0] : vector<256x64xf32> to vector<64xf32>
    %17 = vector.shape_cast %16 : vector<64xf32> to vector<1x64xf32>
    %18 = vector.broadcast %17 : vector<1x64xf32> to vector<8x64xf32>
    %19 = arith.addf %14, %18 : vector<8x64xf32>
    %c0_14 = arith.constant 0 : index
    %c0_15 = arith.constant 0 : index
    %20 = vector.load %arg6[%c0_14, %c0_15] : memref<8x64xf32, #tpu.memory_space<vmem>>, vector<8x64xf32>
    tpu.vector_store %arg6[%c0_14, %c0_15], %19 {strides = array<i32>} : memref<8x64xf32, #tpu.memory_space<vmem>>, vector<8x64xf32>,
    return
  }
  func.func @transform_0(%arg0: i32, %arg1: i32) -> (i32, i32) {
    %c1_i32 = arith.constant 1 : i32
    %0 = arith.muli %arg0, %c1_i32 : i32
    %1 = arith.addi %0, %arg1 : i32
    %c0_i32 = arith.constant 0 : i32
    %c0_i32_0 = arith.constant 0 : i32
    return %1, %c0_i32 : i32, i32
  }
  func.func @transform_1(%arg0: i32, %arg1: i32) -> (i32, i32) {
    %c0_i32 = arith.constant 0 : i32
    %c0_i32_0 = arith.constant 0 : i32
    %c0_i32_1 = arith.constant 0 : i32
    return %c0_i32, %c0_i32_0 : i32, i32
  }
  func.func @transform_2(%arg0: i32, %arg1: i32) -> (i32, i32) {
    %c1_i32 = arith.constant 1 : i32
    %0 = arith.muli %arg0, %c1_i32 : i32
    %1 = arith.addi %0, %arg1 : i32
    %c0_i32 = arith.constant 0 : i32
    %c0_i32_0 = arith.constant 0 : i32
    return %1, %c0_i32 : i32, i32
  }
  func.func @transform_3(%arg0: i32, %arg1: i32) -> (i32, i32) {
    %c0_i32 = arith.constant 0 : i32
    %c0_i32_0 = arith.constant 0 : i32
    return %arg0, %c0_i32 : i32, i32
  }
  func.func @transform_4(%arg0: i32, %arg1: i32) -> (i32, i32) {
    %c0_i32 = arith.constant 0 : i32
    %c0_i32_0 = arith.constant 0 : i32
    return %arg0, %c0_i32 : i32, i32
  }
}

</mosaic_0001>

<bundles_post_ra>
// kernel: tpu_custom_call.1
= control target key start
LH: loop header
LB: loop body
LE: loop exit
PB: predicated region body
PF: predicated region fallthrough
CT: control target
= control target key end

     0   :  { %10 = vsyncpa [#allocation3], 0  ;;  %s2135_s0 = inlined_call_operand.vmem [shape: bf16[512,147], index: 0, kind: input, shape index: {}]   ;;  %s2136_s1 = inlined_call_operand.vmem [shape: bf16[147,64], index: 1, kind: input, shape index: {}]   ;;  %s2137_s2 = inlined_call_operand.vmem [shape: bf16[512,64], index: 2, kind: output, shape index: {0}]   ;;  %s2138_s3 = inlined_call_operand.hbm [shape: f32[16,64], index: 3, kind: output, shape index: {1}]   ;;  %s2139_s4 = inlined_call_operand.hbm [shape: f32[16,64], index: 4, kind: output, shape index: {2}]  }
   0x1   :  { %12 = vsyncpa [#allocation3 + $0x1], 0 }
   0x2   :  { %13 = vsyncpa [#allocation5], 0 }
   0x3   :  { %15 = vsyncpa [#allocation5 + $0x1], 0  ;;  %s1608_s15 = smov 0   ;;  %s1610_s16 = smov 0  }
   0x4   :  { %s1612_s17 = smov 0   ;;  %s1614_s18 = smov 0  }
   0x5   :  { %s1616_s19 = smov 0   ;;  %s1618_s20 = smov 0  }
   0x6 LB: > { %s1157_s21 = sadd.s32 4294967295, %s1579_s20   ;;  %s1158_s22 = sadd.s32 4294967294, %s1579_s20   ;;  %s1579_s20 = sphi %s1618_s20, %s21_s20   ;;  %s1575_s19 = sphi %s1616_s19, %s2146_s19   ;;  %s1571_s18 = sphi %s1614_s18, %s2145_s18   ;;  %s1567_s17 = sphi %s1612_s17, %s2144_s17   ;;  %s1563_s16 = sphi %s1610_s16, %s2143_s16   ;;  %s1559_s15 = sphi %s1608_s15, %s2142_s15  }
   0x7   : > { %s33_s23 = sadd.s32 1, %s1575_s19  ;;  %s117_s24 = sadd.s32 1, %s1567_s17 }
   0x8   : > { %p35_p0 = scmp.ge.s32.totalorder %s33_s23, 2  ;;  %p127_p1 = scmp.ne.s32.totalorder %s1567_s17, %s1563_s16 }
   0x9   : > { %p128_p2 = scmp.eq.s32.totalorder %s1157_s21, 1  ;;  %p133_p3 = scmp.ne.s32.totalorder %s1563_s16, %s1559_s15 }
   0xa   : > { %s2148_s23 = smov (%p35_p0, %s33_s23), 0  ;;  %p134_p5 = scmp.eq.s32.totalorder %s1158_s22, 1 }
   0xb   : > { %p1648_p4 = por %p128_p2, %p127_p1  ;;  %s114_s26 = ssub.s32 %s1575_s19, %s2148_s23 }
   0xc   : > { %p1161_p6 = scmp.ge.s32.totalorder %s1579_s20, 1  ;;  %p115_p7 = scmp.eq.s32.totalorder %s114_s26, 0 }
   0xd   : > { %p1655_p8 = por %p134_p5, %p133_p3  ;;  %p193_p9 = scmp.lt.s32.totalorder %s1579_s20, 3 }
   0xe   : > { %s1661_s28 = scalar_select %p115_p7, %s1567_s17, %s117_s24  }
   0xf   : > { %p194_p10 = pnand %p1161_p6, %p193_p9 }
  0x10   : > { %s1164_s7 = sshll.u32 (!%p194_p10), %s1571_s18, 5  ;;  %s1351_s30 = sshll.u32 (!%p194_p10), %s1571_s18, 3 }
  0x11   : > { %197 = sbr.rel (%p194_p10) target bundleno = 366 (0x16e), region = 28  ;;  %p234_p11 = scmp.lt.s32.totalorder (!%p194_p10), %s1164_s7, 63 }
  0x12   : > { %s1012_s8 = scalar_lea.hbm (!%p194_p10), %s2138_s3, %s1351_s30  ;;  %s1026_s11 = scalar_lea.hbm (!%p194_p10), %s2139_s4, %s1351_s30 }
  0x13   : > { %s1030_s14 = sshll.u32 (!%p194_p10), %s1026_s11, 4  ;;  %s1489_s6 = scalar_lea.hbm (!%p194_p10), %s2138_s3, 16  ;;  %s2084_s14 = int_to_ptr.hbm [resolvable:$true] %s1030_s14 }
  0x16   : > { %v1395_v0 = vld [vmem:[%s2136_s1 + $0x38] sm:$0xff]  ;;  %v300_v1 = vld [vmem:[%s2136_s1 + $0x48] sm:$0x3]  ;;  %vm551_vm0 = vcmask 1040384   ;;  %vm552_vm1 = vcmask 1041408   ;;  %v1394_v3 = vld [vmem:[%s2136_s1 + $0x30] sm:$0xff] }
  0x17   : > { %v482_v2 = vunpack.c.l.b16 %v300_v1  ;;  %558 = vmatpush.bf16.msra.mxu0 %v1395_v0  ;;  %v1581_v4 = vmov 65535   ;;  %1397 = vmatpush.bf16.msra.mxu2 %v1395_v0  ;;  %s2150_s7 = smov (!%p234_p11, %s1164_s7), 63  ;;  %v1393_v9 = vld [vmem:[%s2136_s1 + $0x28] sm:$0xff]  ;;  %v1396_v10 = vld [vmem:[%s2136_s1 + $0x40] sm:$0xff]  ;;  %vm502_vm2 = vcmask 154624   ;;  %v1391_v15 = vld [vmem:[%s2136_s1 + $0x18] sm:$0xff] }
  0x18   : > { %v553_v5 = vsel %vm551_vm0, 4294967295, %v1581_v4  ;;  %s1355_s12 = sshll.u32 %s2150_s7, 3  ;;  %v1392_v14 = vld [vmem:[%s2136_s1 + $0x20] sm:$0xff]  ;;  %v1390_v16 = vld [vmem:[%s2136_s1 + $0x10] sm:$0xff]  ;;  %v1389_v17 = vld [vmem:[%s2136_s1 + $0x8] sm:$0xff]  ;;  %s1168_s13 = sshll.u32 %s2150_s7, 2 }
  0x19   : > { %v492_v6 = vpack.c.b16 %v482_v2, %v482_v2  ;;  %v554_v7 = vsel %vm552_vm1, %v553_v5, 0  ;;  %s1685_s24 = scalar_lea.vmem %s2135_s0, %s1355_s12  ;;  %v1388_v21 = vld [vmem:[%s2136_s1] sm:$0xff]  ;;  %s1786_s22 = scalar_lea.vmem %s2137_s2, %s1168_s13  ;;  %vm768_vm3 = vcmask 519168   ;;  %vm805_vm4 = vcmask 523264  }
  0x1a   : > { %v1356_v11 = vld [vmem:[%s1685_s24 + $0x4] sm:$0xf]  ;;  %v1173_v12 = vld [vmem:[%s1685_s24 + $0x8] sm:$0xf0]  ;;  %v1358_v18 = vld [vmem:[%s1685_s24 + $0x14] sm:$0xf] }
  0x1b   : > { %v556_v8 = vand.u32 %v554_v7, %v492_v6  ;;  %559 = vmatpush.bf16.msra.mxu0 %v1394_v3  ;;  %1398 = vmatpush.bf16.msra.mxu2 %v1394_v3  ;;  %v1176_v13 = vor.u32 %v1356_v11, %v1173_v12  ;;  %v1181_v19 = vld [vmem:[%s1685_s24 + $0x18] sm:$0xf0]  ;;  %v1171_v22 = vld [vmem:[%s1685_s24] sm:$0xf]  ;;  %v1357_v23 = vld [vmem:[%s1685_s24 + $0x4] sm:$0xf0] }
  0x1c   : > { %v1184_v20 = vor.u32 %v1358_v18, %v1181_v19  ;;  %v1235_v24 = vld [vmem:[%s1685_s24 + $0x80] sm:$0xf]  ;;  %v1373_v25 = vld [vmem:[%s1685_s24 + $0x84] sm:$0xf0]  ;;  %v1172_v26 = vor.u32 %v1357_v23, %v1171_v22  ;;  %v1374_v28 = vld [vmem:[%s1685_s24 + $0x94] sm:$0xf] }
  0x1d   : > { %653 = vmatpush.bf16.msra.mxu1 %v556_v8  ;;  %1405 = vmatpush.bf16.msra.mxu3 %v556_v8  ;;  %v1236_v27 = vor.u32 %v1373_v25, %v1235_v24  ;;  %v1245_v29 = vld [vmem:[%s1685_s24 + $0x98] sm:$0xf0]  ;;  %v1360_v31 = vld [vmem:[%s1685_s24 + $0x24] sm:$0xf]  ;;  %v1189_v32 = vld [vmem:[%s1685_s24 + $0x28] sm:$0xf0] }
  0x1e   : > { %v1248_v30 = vor.u32 %v1374_v28, %v1245_v29  ;;  %v1192_v33 = vor.u32 %v1360_v31, %v1189_v32  ;;  %v1179_v34 = vld [vmem:[%s1685_s24 + $0x10] sm:$0xf]  ;;  %v1359_v35 = vld [vmem:[%s1685_s24 + $0x14] sm:$0xf0]  ;;  %v1376_v40 = vld [vmem:[%s1685_s24 + $0xa4] sm:$0xf] }
  0x1f   : > { %560 = vmatpush.bf16.msra.mxu0 %v1393_v9  ;;  %1399 = vmatpush.bf16.msra.mxu2 %v1393_v9  ;;  %v1243_v36 = vld [vmem:[%s1685_s24 + $0x90] sm:$0xf]  ;;  %v1375_v37 = vld [vmem:[%s1685_s24 + $0x94] sm:$0xf0]  ;;  %v1180_v38 = vor.u32 %v1359_v35, %v1179_v34  ;;  %v1253_v41 = vld [vmem:[%s1685_s24 + $0xa8] sm:$0xf0] }
  0x20   : > { %v1244_v39 = vor.u32 %v1375_v37, %v1243_v36  ;;  %v1256_v42 = vor.u32 %v1376_v40, %v1253_v41  ;;  %v1362_v43 = vld [vmem:[%s1685_s24 + $0x34] sm:$0xf]  ;;  %v1197_v44 = vld [vmem:[%s1685_s24 + $0x38] sm:$0xf0]  ;;  %v1187_v46 = vld [vmem:[%s1685_s24 + $0x20] sm:$0xf] }
  0x21   : > { %654 = vmatpush.bf16.msra.mxu1 %v1396_v10  ;;  %1406 = vmatpush.bf16.msra.mxu3 %v1396_v10  ;;  %v1200_v45 = vor.u32 %v1362_v43, %v1197_v44  ;;  %v1361_v47 = vld [vmem:[%s1685_s24 + $0x24] sm:$0xf0]  ;;  %v1251_v48 = vld [vmem:[%s1685_s24 + $0xa0] sm:$0xf]  ;;  %v1378_v52 = vld [vmem:[%s1685_s24 + $0xb4] sm:$0xf] }
  0x22   : > { %v1377_v49 = vld [vmem:[%s1685_s24 + $0xa4] sm:$0xf0]  ;;  %v1188_v50 = vor.u32 %v1361_v47, %v1187_v46  ;;  %v1261_v53 = vld [vmem:[%s1685_s24 + $0xb8] sm:$0xf0]  ;;  %v1364_v55 = vld [vmem:[%s1685_s24 + $0x44] sm:$0xf] }
  0x23   : > { %561 = vmatpush.bf16.msra.mxu0 %v1392_v14  ;;  %1400 = vmatpush.bf16.msra.mxu2 %v1392_v14  ;;  %v1252_v51 = vor.u32 %v1377_v49, %v1251_v48  ;;  %v1264_v54 = vor.u32 %v1378_v52, %v1261_v53  ;;  %v1205_v56 = vld [vmem:[%s1685_s24 + $0x48] sm:$0xf0]  ;;  %v1195_v58 = vld [vmem:[%s1685_s24 + $0x30] sm:$0xf]  ;;  %v1363_v59 = vld [vmem:[%s1685_s24 + $0x34] sm:$0xf0] }
  0x24   : > { %1333 = vmatmul.msk.bf16.vlgmr.msra.gmra.mxu1 %vm502_vm2, %v1176_v13  ;;  %1342 = vmatmul.msk.bf16.vlgmr.msra.gmra.mxu3 %vm502_vm2, %v1248_v30  ;;  %v1208_v57 = vor.u32 %v1364_v55, %v1205_v56  ;;  %v1259_v60 = vld [vmem:[%s1685_s24 + $0xb0] sm:$0xf]  ;;  %v1379_v61 = vld [vmem:[%s1685_s24 + $0xb4] sm:$0xf0]  ;;  %v1196_v62 = vor.u32 %v1363_v59, %v1195_v58  ;;  %v1380_v0 = vld [vmem:[%s1685_s24 + $0xc4] sm:$0xf] }
  0x25   : > { %v1260_v63 = vor.u32 %v1379_v61, %v1259_v60  ;;  %v1269_v1 = vld [vmem:[%s1685_s24 + $0xc8] sm:$0xf0]  ;;  %v1366_v3 = vld [vmem:[%s1685_s24 + $0x54] sm:$0xf]  ;;  %v1213_v4 = vld [vmem:[%s1685_s24 + $0x58] sm:$0xf0] }
  0x26   : > { %v1272_v2 = vor.u32 %v1380_v0, %v1269_v1  ;;  %v1216_v5 = vor.u32 %v1366_v3, %v1213_v4  ;;  %v1203_v6 = vld [vmem:[%s1685_s24 + $0x40] sm:$0xf]  ;;  %v1365_v7 = vld [vmem:[%s1685_s24 + $0x44] sm:$0xf0]  ;;  %v1382_v12 = vld [vmem:[%s1685_s24 + $0xd4] sm:$0xf] }
  0x27   : > { %562 = vmatpush.bf16.msra.mxu0 %v1391_v15  ;;  %1401 = vmatpush.bf16.msra.mxu2 %v1391_v15  ;;  %v1267_v8 = vld [vmem:[%s1685_s24 + $0xc0] sm:$0xf]  ;;  %v1381_v9 = vld [vmem:[%s1685_s24 + $0xc4] sm:$0xf0]  ;;  %v1204_v10 = vor.u32 %v1365_v7, %v1203_v6  ;;  %v1277_v13 = vld [vmem:[%s1685_s24 + $0xd8] sm:$0xf0] }
  0x28   : > { %v1268_v11 = vor.u32 %v1381_v9, %v1267_v8  ;;  %v1280_v14 = vor.u32 %v1382_v12, %v1277_v13  ;;  %v1368_v15 = vld [vmem:[%s1685_s24 + $0x64] sm:$0xf]  ;;  %v1211_v18 = vld [vmem:[%s1685_s24 + $0x50] sm:$0xf]  ;;  %v1367_v19 = vld [vmem:[%s1685_s24 + $0x54] sm:$0xf0] }
  0x29   : > { %v1212_v22 = vor.u32 %v1367_v19, %v1211_v18  ;;  %v1384_v24 = vld [vmem:[%s1685_s24 + $0xe4] sm:$0xf]  ;;  %v1285_v25 = vld [vmem:[%s1685_s24 + $0xe8] sm:$0xf0]  ;;  %v1229_v28 = vld [vmem:[%s1685_s24 + $0x78] sm:$0xf0] }
  0x2a   : > { %v1219_v30 = vld [vmem:[%s1685_s24 + $0x60] sm:$0xf]  ;;  %v1369_v31 = vld [vmem:[%s1685_s24 + $0x64] sm:$0xf0]  ;;  %v1386_v36 = vld [vmem:[%s1685_s24 + $0xf4] sm:$0xf] }
  0x2b   : > { %563 = vmatpush.bf16.msra.mxu0 %v1390_v16  ;;  %1402 = vmatpush.bf16.msra.mxu2 %v1390_v16  ;;  %v1221_v16 = vld [vmem:[%s1685_s24 + $0x68] sm:$0xf0]  ;;  %v1283_v32 = vld [vmem:[%s1685_s24 + $0xe0] sm:$0xf]  ;;  %v1220_v34 = vor.u32 %v1369_v31, %v1219_v30  ;;  %v1293_v37 = vld [vmem:[%s1685_s24 + $0xf8] sm:$0xf0] }
  0x2c   : > { %v1237_v40 = vld [vmem:[%s1685_s24 + $0x88] sm:$0xf0]  ;;  %v1371_v43 = vld [vmem:[%s1685_s24 + $0x74] sm:$0xf0]  ;;  %s1968_s7 = sand.u32 1, %s1563_s16   ;;  %s1016_s13 = sshll.u32 %s1012_s8, 4  ;;  %s1017_s13 = int_to_ptr.hbm [resolvable:$true] %s1016_s13 }
  0x2d   : > { %v1387_v46 = vld [vmem:[%s1685_s24 + $0xf4] sm:$0xf0]  ;;  %s992_s21 = scalar_lea.sflag [#allocation3], %s1968_s7 }
  0x2f   : > { %564 = vmatpush.bf16.msra.mxu0 %v1389_v17  ;;  %1403 = vmatpush.bf16.msra.mxu2 %v1389_v17  ;;  %v1224_v17 = vor.u32 %v1368_v15, %v1221_v16 }
  0x33   : > { %565 = vmatpush.bf16.msra.mxu0 %v1388_v21  ;;  %1404 = vmatpush.bf16.msra.mxu2 %v1388_v21  ;;  %v1383_v21 = vld [vmem:[%s1685_s24 + $0xd4] sm:$0xf0] }
  0x34   : > { %1334 = vmatmul.msk.bf16.gmra.mxu1 %vm502_vm2, %v1184_v20  ;;  %1343 = vmatmul.msk.bf16.gmra.mxu3 %vm502_vm2, %v1256_v42  ;;  %v1275_v20 = vld [vmem:[%s1685_s24 + $0xd0] sm:$0xf] }
  0x35   : > { %v1276_v23 = vor.u32 %v1383_v21, %v1275_v20  ;;  %v1227_v42 = vld [vmem:[%s1685_s24 + $0x70] sm:$0xf] }
  0x36   : > { %566 = vmatmul.bf16.vlgmr.msra.gmra.mxu0 %v1172_v26  ;;  %606 = vmatmul.bf16.vlgmr.msra.gmra.mxu2 %v1236_v27  ;;  %v1288_v26 = vor.u32 %v1384_v24, %v1285_v25  ;;  %v1370_v27 = vld [vmem:[%s1685_s24 + $0x74] sm:$0xf]  ;;  %v1228_v47 = vor.u32 %v1371_v43, %v1227_v42 }
  0x37   : > { %v1232_v29 = vor.u32 %v1370_v27, %v1229_v28 }
  0x44   : > { %1335 = vmatmul.msk.bf16.gmra.mxu1 %vm502_vm2, %v1192_v33  ;;  %1344 = vmatmul.msk.bf16.gmra.mxu3 %vm502_vm2, %v1264_v54  ;;  %v1385_v33 = vld [vmem:[%s1685_s24 + $0xe4] sm:$0xf0] }
  0x45   : > { %v1284_v35 = vor.u32 %v1385_v33, %v1283_v32 }
  0x46   : > { %571 = vmatmul.bf16.gmra.mxu0 %v1180_v38  ;;  %611 = vmatmul.bf16.gmra.mxu2 %v1244_v39  ;;  %v1296_v38 = vor.u32 %v1386_v36, %v1293_v37  ;;  %v1372_v39 = vld [vmem:[%s1685_s24 + $0x84] sm:$0xf] }
  0x47   : > { %v1240_v41 = vor.u32 %v1372_v39, %v1237_v40 }
  0x54   : > { %1336 = vmatmul.msk.bf16.gmra.mxu1 %vm502_vm2, %v1200_v45  ;;  %1345 = vmatmul.msk.bf16.gmra.mxu3 %vm502_vm2, %v1272_v2  ;;  %v1291_v45 = vld [vmem:[%s1685_s24 + $0xf0] sm:$0xf]  ;;  %s1162_s24 = sshll.u32 %s1968_s7, 3 }
  0x55   : > { %v1292_v48 = vor.u32 %v1387_v46, %v1291_v45  ;;  %s1995_s26 = scalar_lea.vmem [#allocation2], %s1162_s24  ;;  %s2004_s29 = scalar_lea.vmem [#allocation4], %s1162_s24 }
  0x56   : > { %576 = vmatmul.bf16.gmra.mxu0 %v1188_v50  ;;  %616 = vmatmul.bf16.gmra.mxu2 %v1252_v51  ;;  %s1014_s12 = sshll.u32 %s1995_s26, 4  ;;  %s1028_s18 = sshll.u32 %s2004_s29, 4  ;;  %s1015_s12 = int_to_ptr.vmem [resolvable:$true] %s1014_s12  ;;  %s2082_s18 = int_to_ptr.vmem [resolvable:$true] %s1028_s18 }
  0x64   : > { %1337 = vmatmul.msk.bf16.gmra.mxu1 %vm502_vm2, %v1208_v57  ;;  %1346 = vmatmul.msk.bf16.gmra.mxu3 %vm502_vm2, %v1280_v14 }
  0x66   : > { %581 = vmatmul.bf16.gmra.mxu0 %v1196_v62  ;;  %621 = vmatmul.bf16.gmra.mxu2 %v1260_v63 }
  0x74   : > { %1338 = vmatmul.msk.bf16.gmra.mxu1 %vm502_vm2, %v1216_v5  ;;  %1347 = vmatmul.msk.bf16.gmra.mxu3 %vm502_vm2, %v1288_v26 }
  0x76   : > { %586 = vmatmul.bf16.gmra.mxu0 %v1204_v10  ;;  %626 = vmatmul.bf16.gmra.mxu2 %v1268_v11 }
  0x84   : > { %1339 = vmatmul.msk.bf16.gmra.mxu1 %vm502_vm2, %v1224_v17  ;;  %1348 = vmatmul.msk.bf16.gmra.mxu3 %vm502_vm2, %v1296_v38 }
  0x86   : > { %591 = vmatmul.bf16.gmra.mxu0 %v1212_v22  ;;  %631 = vmatmul.bf16.gmra.mxu2 %v1276_v23 }
  0x94   : > { %1340 = vmatmul.msk.bf16.gmra.mxu1 %vm502_vm2, %v1232_v29 }
  0x96   : > { %596 = vmatmul.bf16.gmra.mxu0 %v1220_v34  ;;  %636 = vmatmul.bf16.gmra.mxu2 %v1284_v35 }
  0xa1   : > { %v656_v44 = vpop.f32.mrf.mxu1 }
  0xa4   : > { %1341 = vmatmul.msk.bf16.gmra.mxu1 %vm502_vm2, %v1240_v41 }
  0xa6   : > { %601 = vmatmul.bf16.gmra.mxu0 %v1228_v47  ;;  %641 = vmatmul.bf16.gmra.mxu2 %v1292_v48 }
  0xa7   : > { %v701_v59 = vpop.f32.mrf.mxu3 }
  0xa9   : > { %v658_v49 = vpop.f32.mrf.mxu1 }
  0xaf   : > { %v703_v8 = vpop.f32.mrf.mxu3 }
  0xb1   : > { %v661_v50 = vpop.f32.mrf.mxu1 }
  0xb3   : > { %v567_v51 = vpop.f32.mrf.mxu0 }
  0xb4   : > { %v657_v52 = vadd.f32 %v656_v44, %v567_v51 }
  0xb6   : > { %v736_v53 = vpack.c.bf16 %v657_v52, %v657_v52  ;;  %v882_v57 = vmul.f32 %v657_v52, %v657_v52  ;;  %v810_v60 = vsel %vm805_vm4, %v657_v52, 0.0 }
  0xb7   : > { %v706_v20 = vpop.f32.mrf.mxu3 }
  0xb8   : > { %769 = vst.msk [vmem:[%s1786_s22] sm:$0xf] %vm768_vm3, %v736_v53  ;;  %v914_v1 = vsel %vm805_vm4, %v882_v57, 0.0 }
  0xb9   : > { %v663_v54 = vpop.f32.mrf.mxu1  ;;  %v1790_v55 = vpop.f32.mrf.mxu2 }
  0xbb   : > { %v569_v56 = vpop.f32.mrf.mxu0 }
  0xbc   : > { %v659_v58 = vadd.f32 %v658_v49, %v569_v56 }
  0xbe   : > { %v737_v61 = vpack.c.bf16 %v659_v58, %v659_v58  ;;  %v811_v62 = vsel %vm805_vm4, %v659_v58, 0.0  ;;  %v883_v63 = vmul.f32 %v659_v58, %v659_v58 }
  0xbf   : > { %v812_v0 = vadd.f32 %v811_v62, %v810_v60  ;;  %v708_v33 = vpop.f32.mrf.mxu3 }
  0xc0   : > { %770 = vst.msk [vmem:[%s1786_s22 + $0x4] sm:$0xf] %vm768_vm3, %v737_v61  ;;  %v915_v2 = vsel %vm805_vm4, %v883_v63, 0.0 }
  0xc1   : > { %v666_v3 = vpop.f32.mrf.mxu1  ;;  %v916_v4 = vadd.f32 %v915_v2, %v914_v1  ;;  %v1798_v5 = vpop.f32.mrf.mxu2 }
  0xc3   : > { %v572_v6 = vpop.f32.mrf.mxu0 }
  0xc4   : > { %v662_v7 = vadd.f32 %v661_v50, %v572_v6 }
  0xc6   : > { %v738_v9 = vpack.c.bf16 %v662_v7, %v662_v7  ;;  %v813_v10 = vsel %vm805_vm4, %v662_v7, 0.0  ;;  %v884_v11 = vmul.f32 %v662_v7, %v662_v7 }
  0xc7   : > { %v814_v12 = vadd.f32 %v813_v10, %v812_v0  ;;  %v711_v46 = vpop.f32.mrf.mxu3 }
  0xc8   : > { %771 = vst.msk [vmem:[%s1786_s22 + $0x8] sm:$0xf] %vm768_vm3, %v738_v9  ;;  %v917_v13 = vsel %vm805_vm4, %v884_v11, 0.0 }
  0xc9   : > { %v668_v14 = vpop.f32.mrf.mxu1  ;;  %v918_v15 = vadd.f32 %v917_v13, %v916_v4  ;;  %v612_v16 = vpop.f32.mrf.mxu2 }
  0xca   : > { %v1804_v18 = vadd.f32 %v701_v59, %v612_v16 }
  0xcb   : > { %v574_v17 = vpop.f32.mrf.mxu0 }
  0xcc   : > { %v664_v19 = vadd.f32 %v663_v54, %v574_v17  ;;  %v754_v21 = vpack.c.bf16 %v1804_v18, %v1804_v18 }
  0xce   : > { %v739_v22 = vpack.c.bf16 %v664_v19, %v664_v19  ;;  %v815_v23 = vsel %vm805_vm4, %v664_v19, 0.0  ;;  %v885_v24 = vmul.f32 %v664_v19, %v664_v19  ;;  %787 = vst.msk [vmem:[%s1786_s22 + $0x48] sm:$0xf] %vm768_vm3, %v754_v21 }
  0xcf   : > { %v816_v25 = vadd.f32 %v815_v23, %v814_v12  ;;  %v713_v54 = vpop.f32.mrf.mxu3 }
  0xd0   : > { %772 = vst.msk [vmem:[%s1786_s22 + $0xc] sm:$0xf] %vm768_vm3, %v739_v22  ;;  %v919_v26 = vsel %vm805_vm4, %v885_v24, 0.0 }
  0xd1   : > { %v671_v27 = vpop.f32.mrf.mxu1  ;;  %v920_v28 = vadd.f32 %v919_v26, %v918_v15  ;;  %v614_v29 = vpop.f32.mrf.mxu2 }
  0xd2   : > { %v1814_v31 = vadd.f32 %v703_v8, %v614_v29 }
  0xd3   : > { %v577_v30 = vpop.f32.mrf.mxu0 }
  0xd4   : > { %v667_v32 = vadd.f32 %v666_v3, %v577_v30  ;;  %v755_v34 = vpack.c.bf16 %v1814_v31, %v1814_v31 }
  0xd6   : > { %v740_v35 = vpack.c.bf16 %v667_v32, %v667_v32  ;;  %v817_v36 = vsel %vm805_vm4, %v667_v32, 0.0  ;;  %v886_v37 = vmul.f32 %v667_v32, %v667_v32  ;;  %788 = vst.msk [vmem:[%s1786_s22 + $0x4c] sm:$0xf] %vm768_vm3, %v755_v34 }
  0xd7   : > { %v1819_v38 = vadd.f32 %v817_v36, %v816_v25  ;;  %v716_v63 = vpop.f32.mrf.mxu3 }
  0xd8   : > { %773 = vst.msk [vmem:[%s1786_s22 + $0x10] sm:$0xf] %vm768_vm3, %v740_v35  ;;  %v921_v39 = vsel %vm805_vm4, %v886_v37, 0.0 }
  0xd9   : > { %v673_v40 = vpop.f32.mrf.mxu1  ;;  %v1826_v41 = vadd.f32 %v921_v39, %v920_v28  ;;  %v617_v42 = vpop.f32.mrf.mxu2 }
  0xda   : > { %v1828_v44 = vadd.f32 %v706_v20, %v617_v42 }
  0xdb   : > { %v579_v43 = vpop.f32.mrf.mxu0 }
  0xdc   : > { %v1830_v45 = vadd.f32 %v668_v14, %v579_v43  ;;  %v756_v47 = vpack.c.bf16 %v1828_v44, %v1828_v44 }
  0xde   : > { %v741_v48 = vpack.c.bf16 %v1830_v45, %v1830_v45  ;;  %789 = vst.msk [vmem:[%s1786_s22 + $0x50] sm:$0xf] %vm768_vm3, %v756_v47  ;;  %v887_v47 = vmul.f32 %v1830_v45, %v1830_v45 }
  0xdf   : > { %v718_v8 = vpop.f32.mrf.mxu3 }
  0xe0   : > { %774 = vst.msk [vmem:[%s1786_s22 + $0x14] sm:$0xf] %vm768_vm3, %v741_v48 }
  0xe1   : > { %v676_v49 = vpop.f32.mrf.mxu1  ;;  %v619_v50 = vpop.f32.mrf.mxu2 }
  0xe2   : > { %v1840_v52 = vadd.f32 %v708_v33, %v619_v50 }
  0xe3   : > { %v582_v51 = vpop.f32.mrf.mxu0 }
  0xe4   : > { %v1842_v53 = vadd.f32 %v671_v27, %v582_v51  ;;  %v757_v56 = vpack.c.bf16 %v1840_v52, %v1840_v52 }
  0xe6   : > { %v742_v57 = vpack.c.bf16 %v1842_v53, %v1842_v53  ;;  %790 = vst.msk [vmem:[%s1786_s22 + $0x54] sm:$0xf] %vm768_vm3, %v757_v56  ;;  %v888_v50 = vmul.f32 %v1842_v53, %v1842_v53  ;;  %v821_v56 = vsel %vm805_vm4, %v1842_v53, 0.0 }
  0xe7   : > { %v721_v19 = vpop.f32.mrf.mxu3 }
  0xe8   : > { %775 = vst.msk [vmem:[%s1786_s22 + $0x18] sm:$0xf] %vm768_vm3, %v742_v57 }
  0xe9   : > { %v678_v58 = vpop.f32.mrf.mxu1  ;;  %v622_v59 = vpop.f32.mrf.mxu2 }
  0xea   : > { %v1852_v61 = vadd.f32 %v711_v46, %v622_v59 }
  0xeb   : > { %v584_v60 = vpop.f32.mrf.mxu0 }
  0xec   : > { %v1854_v62 = vadd.f32 %v673_v40, %v584_v60  ;;  %v758_v0 = vpack.c.bf16 %v1852_v61, %v1852_v61 }
  0xee   : > { %v743_v1 = vpack.c.bf16 %v1854_v62, %v1854_v62  ;;  %791 = vst.msk [vmem:[%s1786_s22 + $0x58] sm:$0xf] %vm768_vm3, %v758_v0  ;;  %v889_v57 = vmul.f32 %v1854_v62, %v1854_v62  ;;  %v823_v0 = vsel %vm805_vm4, %v1854_v62, 0.0 }
  0xef   : > { %v723_v28 = vpop.f32.mrf.mxu3 }
  0xf0   : > { %776 = vst.msk [vmem:[%s1786_s22 + $0x1c] sm:$0xf] %vm768_vm3, %v743_v1 }
  0xf1   : > { %v681_v2 = vpop.f32.mrf.mxu1  ;;  %v624_v3 = vpop.f32.mrf.mxu2 }
  0xf2   : > { %v1864_v6 = vadd.f32 %v713_v54, %v624_v3  ;;  %v923_v54 = vsel %vm805_vm4, %v887_v47, 0.0 }
  0xf3   : > { %v587_v4 = vpop.f32.mrf.mxu0  ;;  %v924_v3 = vadd.f32 %v923_v54, %v1826_v41 }
  0xf4   : > { %v1866_v7 = vadd.f32 %v676_v49, %v587_v4  ;;  %v759_v9 = vpack.c.bf16 %v1864_v6, %v1864_v6  ;;  %v819_v49 = vsel %vm805_vm4, %v1830_v45, 0.0 }
  0xf5   : > { %v820_v59 = vadd.f32 %v819_v49, %v1819_v38 }
  0xf6   : > { %v744_v10 = vpack.c.bf16 %v1866_v7, %v1866_v7  ;;  %792 = vst.msk [vmem:[%s1786_s22 + $0x5c] sm:$0xf] %vm768_vm3, %v759_v9  ;;  %v890_v1 = vmul.f32 %v1866_v7, %v1866_v7  ;;  %v825_v9 = vsel %vm805_vm4, %v1866_v7, 0.0 }
  0xf7   : > { %v726_v39 = vpop.f32.mrf.mxu3  ;;  %v822_v4 = vadd.f32 %v821_v56, %v820_v59 }
  0xf8   : > { %777 = vst.msk [vmem:[%s1786_s22 + $0x20] sm:$0xf] %vm768_vm3, %v744_v10 }
  0xf9   : > { %v683_v11 = vpop.f32.mrf.mxu1  ;;  %v627_v12 = vpop.f32.mrf.mxu2 }
  0xfa   : > { %v1876_v14 = vadd.f32 %v716_v63, %v627_v12  ;;  %v925_v63 = vsel %vm805_vm4, %v888_v50, 0.0  ;;  %v824_v12 = vadd.f32 %v823_v0, %v822_v4 }
  0xfb   : > { %v589_v13 = vpop.f32.mrf.mxu0  ;;  %v926_v62 = vadd.f32 %v925_v63, %v924_v3 }
  0xfc   : > { %v679_v15 = vadd.f32 %v678_v58, %v589_v13  ;;  %v760_v16 = vpack.c.bf16 %v1876_v14, %v1876_v14  ;;  %v929_v13 = vsel %vm805_vm4, %v890_v1, 0.0 }
  0xfe   : > { %v745_v17 = vpack.c.bf16 %v679_v15, %v679_v15  ;;  %793 = vst.msk [vmem:[%s1786_s22 + $0x60] sm:$0xf] %vm768_vm3, %v760_v16  ;;  %v891_v10 = vmul.f32 %v679_v15, %v679_v15  ;;  %v827_v16 = vsel %vm805_vm4, %v679_v15, 0.0 }
 0x100   : > { %778 = vst.msk [vmem:[%s1786_s22 + $0x24] sm:$0xf] %vm768_vm3, %v745_v17  ;;  %v931_v7 = vsel %vm805_vm4, %v891_v10, 0.0 }
 0x101   : > { %v686_v20 = vpop.f32.mrf.mxu1  ;;  %v629_v21 = vpop.f32.mrf.mxu2 }
 0x102   : > { %v1884_v23 = vadd.f32 %v718_v8, %v629_v21  ;;  %v927_v8 = vsel %vm805_vm4, %v889_v57, 0.0 }
 0x103   : > { %v592_v22 = vpop.f32.mrf.mxu0 }
 0x104   : > { %v682_v24 = vadd.f32 %v681_v2, %v592_v22  ;;  %v761_v25 = vpack.c.bf16 %v1884_v23, %v1884_v23  ;;  %v728_v2 = vpop.f32.mrf.mxu3 }
 0x106   : > { %v746_v26 = vpack.c.bf16 %v682_v24, %v682_v24  ;;  %794 = vst.msk [vmem:[%s1786_s22 + $0x64] sm:$0xf] %vm768_vm3, %v761_v25  ;;  %v892_v41 = vmul.f32 %v682_v24, %v682_v24  ;;  %v829_v22 = vsel %vm805_vm4, %v682_v24, 0.0 }
 0x108   : > { %779 = vst.msk [vmem:[%s1786_s22 + $0x28] sm:$0xf] %vm768_vm3, %v746_v26 }
 0x109   : > { %v688_v27 = vpop.f32.mrf.mxu1  ;;  %v632_v29 = vpop.f32.mrf.mxu2 }
 0x10a   : > { %v1892_v32 = vadd.f32 %v721_v19, %v632_v29  ;;  %v928_v19 = vadd.f32 %v927_v8, %v926_v62 }
 0x10b   : > { %v594_v30 = vpop.f32.mrf.mxu0 }
 0x10c   : > { %v684_v33 = vadd.f32 %v683_v11, %v594_v30  ;;  %v762_v34 = vpack.c.bf16 %v1892_v32, %v1892_v32  ;;  %v731_v50 = vpop.f32.mrf.mxu3 }
 0x10e   : > { %v747_v35 = vpack.c.bf16 %v684_v33, %v684_v33  ;;  %795 = vst.msk [vmem:[%s1786_s22 + $0x68] sm:$0xf] %vm768_vm3, %v762_v34  ;;  %v893_v25 = vmul.f32 %v684_v33, %v684_v33  ;;  %v933_v34 = vsel %vm805_vm4, %v892_v41, 0.0 }
 0x110   : > { %780 = vst.msk [vmem:[%s1786_s22 + $0x2c] sm:$0xf] %vm768_vm3, %v747_v35  ;;  %v831_v35 = vsel %vm805_vm4, %v684_v33, 0.0 }
 0x111   : > { %v691_v36 = vpop.f32.mrf.mxu1  ;;  %v634_v37 = vpop.f32.mrf.mxu2 }
 0x112   : > { %v1900_v42 = vadd.f32 %v723_v28, %v634_v37 }
 0x113   : > { %v597_v40 = vpop.f32.mrf.mxu0 }
 0x114   : > { %v687_v43 = vadd.f32 %v686_v20, %v597_v40  ;;  %v763_v46 = vpack.c.bf16 %v1900_v42, %v1900_v42  ;;  %v826_v20 = vadd.f32 %v825_v9, %v824_v12 }
 0x116   : > { %v748_v48 = vpack.c.bf16 %v687_v43, %v687_v43  ;;  %796 = vst.msk [vmem:[%s1786_s22 + $0x6c] sm:$0xf] %vm768_vm3, %v763_v46  ;;  %v828_v28 = vadd.f32 %v827_v16, %v826_v20  ;;  %v894_v37 = vmul.f32 %v687_v43, %v687_v43  ;;  %v935_v46 = vsel %vm805_vm4, %v893_v25, 0.0 }
 0x117   : > { %v833_v47 = vsel %vm805_vm4, %v687_v43, 0.0 }
 0x118   : > { %781 = vst.msk [vmem:[%s1786_s22 + $0x30] sm:$0xf] %vm768_vm3, %v748_v48  ;;  %v830_v40 = vadd.f32 %v829_v22, %v828_v28  ;;  %v937_v33 = vsel %vm805_vm4, %v894_v37, 0.0  ;;  %v901_v37 = vmul.f32 %v1814_v31, %v1814_v31 }
 0x119   : > { %v1914_v51 = vpop.f32.mrf.mxu1  ;;  %v637_v58 = vpop.f32.mrf.mxu2 }
 0x11a   : > { %v1922_v45 = vadd.f32 %v726_v39, %v637_v58  ;;  %v832_v56 = vadd.f32 %v831_v35, %v830_v40 }
 0x11b   : > { %v599_v60 = vpop.f32.mrf.mxu0 }
 0x11c   : > { %v689_v53 = vadd.f32 %v688_v27, %v599_v60  ;;  %v764_v38 = vpack.c.bf16 %v1922_v45, %v1922_v45  ;;  %v930_v27 = vadd.f32 %v929_v13, %v928_v19  ;;  %v834_v60 = vadd.f32 %v833_v47, %v832_v56 }
 0x11d   : > { %v849_v56 = vsel %vm805_vm4, %v1828_v44, 0.0 }
 0x11e   : > { %v749_v11 = vpack.c.bf16 %v689_v53, %v689_v53  ;;  %797 = vst.msk [vmem:[%s1786_s22 + $0x70] sm:$0xf] %vm768_vm3, %v764_v38  ;;  %v932_v39 = vadd.f32 %v931_v7, %v930_v27  ;;  %v895_v48 = vmul.f32 %v689_v53, %v689_v53  ;;  %v733_v7 = vpop.f32.mrf.mxu3 }
 0x120   : > { %782 = vst.msk [vmem:[%s1786_s22 + $0x34] sm:$0xf] %vm768_vm3, %v749_v11  ;;  %v934_v54 = vadd.f32 %v933_v34, %v932_v39  ;;  %v939_v63 = vsel %vm805_vm4, %v895_v48, 0.0  ;;  %v902_v48 = vmul.f32 %v1828_v44, %v1828_v44  ;;  %v853_v44 = vsel %vm805_vm4, %v1852_v61, 0.0 }
 0x121   : > { %v696_v17 = vpop.f32.mrf.mxu1  ;;  %v639_v26 = vpop.f32.mrf.mxu2 }
 0x122   : > { %v697_v21 = vadd.f32 %v696_v17, %v1790_v55  ;;  %v1944_v15 = vadd.f32 %v728_v2, %v639_v26  ;;  %v936_v59 = vadd.f32 %v935_v46, %v934_v54  ;;  %v900_v26 = vmul.f32 %v1804_v18, %v1804_v18 }
 0x123   : > { %v602_v30 = vpop.f32.mrf.mxu0  ;;  %v1582_v46 = vmov 0.0   ;;  %v951_v54 = vsel %vm805_vm4, %v901_v37, 0.0 }
 0x124   : > { %v752_v29 = vpack.c.bf16 %v697_v21, %v697_v21  ;;  %v692_v55 = vadd.f32 %v691_v36, %v602_v30  ;;  %v765_v24 = vpack.c.bf16 %v1944_v15, %v1944_v15  ;;  %v835_v36 = vsel %vm805_vm4, %v689_v53, 0.0  ;;  %806 = vst.msk [vmem:[%s1995_s26] sm:$0xff] %vm805_vm4, %v1582_v46 }
 0x125   : > { %v938_v2 = vadd.f32 %v937_v33, %v936_v59  ;;  %v836_v3 = vadd.f32 %v835_v36, %v834_v60  ;;  %v898_v62 = vmul.f32 %v697_v21, %v697_v21  ;;  %v949_v47 = vsel %vm805_vm4, %v900_v26, 0.0  ;;  %807 = vst.msk [vmem:[%s2004_s29] sm:$0xff] %vm805_vm4, %v1582_v46 }
 0x126   : > { %785 = vst.msk [vmem:[%s1786_s22 + $0x40] sm:$0xf] %vm768_vm3, %v752_v29  ;;  %v750_v49 = vpack.c.bf16 %v692_v55, %v692_v55  ;;  %v896_v57 = vmul.f32 %v692_v55, %v692_v55  ;;  %v837_v0 = vsel %vm805_vm4, %v692_v55, 0.0  ;;  %v904_v59 = vmul.f32 %v1852_v61, %v1852_v61 }
 0x127   : > { %798 = vst.msk [vmem:[%s1786_s22 + $0x74] sm:$0xf] %vm768_vm3, %v765_v24  ;;  %v838_v10 = vadd.f32 %v837_v0, %v836_v3  ;;  %v945_v27 = vsel %vm805_vm4, %v898_v62, 0.0  ;;  %v905_v0 = vmul.f32 %v1864_v6, %v1864_v6  ;;  %v857_v61 = vsel %vm805_vm4, %v1876_v14, 0.0 }
 0x128   : > { %783 = vst.msk [vmem:[%s1786_s22 + $0x38] sm:$0xf] %vm768_vm3, %v750_v49  ;;  %v941_v8 = vsel %vm805_vm4, %v896_v57, 0.0  ;;  %v953_v57 = vsel %vm805_vm4, %v902_v48, 0.0  ;;  %v957_v3 = vsel %vm805_vm4, %v904_v59, 0.0 }
 0x129   : > { %v698_v58 = vpop.f32.mrf.mxu1  ;;  %v642_v1 = vpop.f32.mrf.mxu2 }
 0x12a   : > { %v699_v43 = vadd.f32 %v698_v58, %v1798_v5  ;;  %v1963_v38 = vadd.f32 %v731_v50, %v642_v1  ;;  %v940_v5 = vadd.f32 %v939_v63, %v938_v2  ;;  %v851_v58 = vsel %vm805_vm4, %v1840_v52, 0.0 }
 0x12b   : > { %v604_v53 = vpop.f32.mrf.mxu0 }
 0x12c   : > { %v753_v4 = vpack.c.bf16 %v699_v43, %v699_v43  ;;  %v694_v9 = vadd.f32 %v1914_v51, %v604_v53  ;;  %v766_v11 = vpack.c.bf16 %v1963_v38, %v1963_v38  ;;  %v942_v41 = vadd.f32 %v941_v8, %v940_v5 }
 0x12d   : > { %v841_v51 = vsel %vm805_vm4, %v697_v21, 0.0  ;;  %v899_v19 = vmul.f32 %v699_v43, %v699_v43  ;;  %v843_v28 = vsel %vm805_vm4, %v699_v43, 0.0  ;;  %v845_v21 = vsel %vm805_vm4, %v1804_v18, 0.0 }
 0x12e   : > { %786 = vst.msk [vmem:[%s1786_s22 + $0x44] sm:$0xf] %vm768_vm3, %v753_v4  ;;  %v751_v12 = vpack.c.bf16 %v694_v9, %v694_v9  ;;  %v839_v13 = vsel %vm805_vm4, %v694_v9, 0.0  ;;  %v897_v16 = vmul.f32 %v694_v9, %v694_v9  ;;  %v847_v18 = vsel %vm805_vm4, %v1814_v31, 0.0 }
 0x12f   : > { %v840_v17 = vadd.f32 %v839_v13, %v838_v10  ;;  %799 = vst.msk [vmem:[%s1786_s22 + $0x78] sm:$0xf] %vm768_vm3, %v766_v11  ;;  %v947_v55 = vsel %vm805_vm4, %v899_v19, 0.0  ;;  %v903_v31 = vmul.f32 %v1840_v52, %v1840_v52  ;;  %v855_v52 = vsel %vm805_vm4, %v1864_v6, 0.0 }
 0x130   : > { %784 = vst.msk [vmem:[%s1786_s22 + $0x3c] sm:$0xf] %vm768_vm3, %v751_v12  ;;  %v943_v20 = vsel %vm805_vm4, %v897_v16, 0.0  ;;  %v906_v4 = vmul.f32 %v1876_v14, %v1876_v14  ;;  %v959_v9 = vsel %vm805_vm4, %v905_v0, 0.0  ;;  %v907_v5 = vmul.f32 %v1884_v23, %v1884_v23 }
 0x131   : > { %v842_v22 = vadd.f32 %v841_v51, %v840_v17  ;;  %v944_v25 = vadd.f32 %v943_v20, %v942_v41  ;;  %v644_v29 = vpop.f32.mrf.mxu2  ;;  %v955_v63 = vsel %vm805_vm4, %v903_v31, 0.0  ;;  %v859_v6 = vsel %vm805_vm4, %v1884_v23, 0.0 }
 0x132   : > { %v1986_v35 = vadd.f32 %v733_v7, %v644_v29  ;;  %v961_v62 = vsel %vm805_vm4, %v906_v4, 0.0  ;;  %v908_v12 = vmul.f32 %v1892_v32, %v1892_v32  ;;  %v963_v41 = vsel %vm805_vm4, %v907_v5, 0.0 }
 0x133   : > { %v844_v30 = vadd.f32 %v843_v28, %v842_v22  ;;  %v946_v34 = vadd.f32 %v945_v27, %v944_v25  ;;  %v861_v14 = vsel %vm805_vm4, %v1892_v32, 0.0  ;;  %v909_v17 = vmul.f32 %v1900_v42, %v1900_v42 }
 0x134   : > { %v767_v24 = vpack.c.bf16 %v1986_v35, %v1986_v35  ;;  %v965_v20 = vsel %vm805_vm4, %v908_v12, 0.0  ;;  %v863_v23 = vsel %vm805_vm4, %v1900_v42, 0.0  ;;  %v910_v7 = vmul.f32 %v1922_v45, %v1922_v45 }
 0x135   : > { %v846_v39 = vadd.f32 %v845_v21, %v844_v30  ;;  %v948_v40 = vadd.f32 %v947_v55, %v946_v34  ;;  %v967_v26 = vsel %vm805_vm4, %v909_v17, 0.0  ;;  %v865_v32 = vsel %vm805_vm4, %v1922_v45, 0.0 }
 0x136   : > { %800 = vst.msk [vmem:[%s1786_s22 + $0x7c] sm:$0xf] %vm768_vm3, %v767_v24  ;;  %v911_v27 = vmul.f32 %v1944_v15, %v1944_v15  ;;  %v969_v30 = vsel %vm805_vm4, %v910_v7, 0.0  ;;  %v867_v42 = vsel %vm805_vm4, %v1944_v15, 0.0  ;;  %v912_v34 = vmul.f32 %v1963_v38, %v1963_v38  ;;  %s1483_s22 = sshra.s32 %s1017_s13, 4  ;;  %s1484_s22 = int_to_ptr.hbm [resolvable:$true] %s1483_s22 }
 0x137   : > { %v848_v49 = vadd.f32 %v847_v18, %v846_v39  ;;  %v950_v50 = vadd.f32 %v949_v47, %v948_v40  ;;  %v869_v45 = vsel %vm805_vm4, %v1963_v38, 0.0  ;;  %v913_v39 = vmul.f32 %v1986_v35, %v1986_v35  ;;  %s1485_s24 = scalar_lea.hbm %s1484_s22, 8  ;;  %p1490_p1 = scmp.lt.s32.totalorder %s1484_s22, %s2138_s3 }
 0x138   : > { %v971_v55 = vsel %vm805_vm4, %v911_v27, 0.0  ;;  %v973_v46 = vsel %vm805_vm4, %v912_v34, 0.0  ;;  %v871_v15 = vsel %vm805_vm4, %v1986_v35, 0.0  ;;  %p1486_p12 = scmp.ne.s32.totalorder %s1484_s22, %s1485_s24  ;;  %p1491_p2 = scmp.lt.s32.totalorder %s1489_s6, %s1485_s24 }
 0x139   : > { %v850_v33 = vadd.f32 %v849_v56, %v848_v49  ;;  %v952_v36 = vadd.f32 %v951_v54, %v950_v50  ;;  %v975_v48 = vsel %vm805_vm4, %v913_v39, 0.0 }
 0x13a   : > { %p1487_p13 = pnand %p1486_p12, %p1648_p4  ;;  %p1492_p3 = por %p1491_p2, %p1490_p1 }
 0x13b   : > { %v852_v60 = vadd.f32 %v851_v58, %v850_v33  ;;  %v954_v43 = vadd.f32 %v953_v57, %v952_v36  ;;  %v808_v58 = vld [vmem:[%s1995_s26] sm:$0xff] }
 0x13c   : > { %p1488_p0 = pneg %p1487_p13 }
 0x13d   : > { %v956_v1 = vadd.f32 %v955_v63, %v954_v43  ;;  %v854_v2 = vadd.f32 %v853_v44, %v852_v60  ;;  %v881_v43 = vld [vmem:[%s2004_s29] sm:$0xff] }
 0x13e   : > { %p1493_p5 = pnand %p1492_p3, %p1488_p0 }
 0x13f   : > { %v856_v53 = vadd.f32 %v855_v52, %v854_v2  ;;  %v958_v8 = vadd.f32 %v957_v3, %v956_v1 }
 0x141   : > { %v858_v10 = vadd.f32 %v857_v61, %v856_v53  ;;  %v960_v11 = vadd.f32 %v959_v9, %v958_v8 }
 0x143   : > { %v860_v13 = vadd.f32 %v859_v6, %v858_v10  ;;  %v962_v16 = vadd.f32 %v961_v62, %v960_v11 }
 0x145   : > { %v862_v51 = vadd.f32 %v861_v14, %v860_v13  ;;  %v964_v19 = vadd.f32 %v963_v41, %v962_v16 }
 0x147   : > { %v864_v22 = vadd.f32 %v863_v23, %v862_v51  ;;  %v966_v25 = vadd.f32 %v965_v20, %v964_v19 }
 0x149   : > { %v866_v28 = vadd.f32 %v865_v32, %v864_v22  ;;  %v968_v29 = vadd.f32 %v967_v26, %v966_v25 }
 0x14b   : > { %v970_v21 = vadd.f32 %v969_v30, %v968_v29  ;;  %v868_v37 = vadd.f32 %v867_v42, %v866_v28 }
 0x14d   : > { %v972_v40 = vadd.f32 %v971_v55, %v970_v21  ;;  %v870_v24 = vadd.f32 %v869_v45, %v868_v37 }
 0x14f   : > { %v974_v47 = vadd.f32 %v973_v46, %v972_v40  ;;  %v872_v18 = vadd.f32 %v871_v15, %v870_v24 }
 0x151   : > { %v873_v49 = vrot.slane %v872_v18, 4  ;;  %v976_v50 = vadd.f32 %v975_v48, %v974_v47 }
 0x153   : > { %v874_v54 = vadd.f32 %v873_v49, %v872_v18  ;;  %v977_v38 = vrot.slane %v976_v50, 4 }
 0x155   : > { %v875_v56 = vrot.slane %v874_v54, 2  ;;  %v978_v31 = vadd.f32 %v977_v38, %v976_v50 }
 0x157   : > { %v876_v33 = vadd.f32 %v875_v56, %v874_v54  ;;  %v979_v36 = vrot.slane %v978_v31, 2 }
 0x159   : > { %v877_v35 = vrot.slane %v876_v33, 1  ;;  %v980_v57 = vadd.f32 %v979_v36, %v978_v31 }
 0x15b   : > { %v878_v59 = vadd.f32 %v877_v35, %v876_v33  ;;  %v981_v60 = vrot.slane %v980_v57, 1 }
 0x15d   : > { %v879_v63 = vadd.f32 %v878_v59, %v808_v58  ;;  %v982_v44 = vadd.f32 %v981_v60, %v980_v57 }
 0x15f   : > { %880 = vst.msk [vmem:[%s1995_s26] sm:$0xff] %vm805_vm4, %v879_v63  ;;  %v983_v0 = vadd.f32 %v982_v44, %v881_v43 }
 0x160   : > { %1496 = shalt.err (!%p1493_p5)
}
 0x161   : > { %1407 = dma.vmem_to_hbm [thread:$0]  (%p1648_p4), %s1015_s12, 128, %s1017_s13, %s992_s21   ;;  %984 = vst.msk [vmem:[%s2004_s29] sm:$0xff] %vm805_vm4, %v983_v0 }
 0x162   : > { %s997_s26 = scalar_lea.sflag [#allocation5], %s1968_s7  ;;  %s1511_s10 = sshra.s32 %s2084_s14, 4  ;;  %s1512_s10 = int_to_ptr.hbm [resolvable:$true] %s1511_s10 }
 0x163   : > { %s1513_s11 = scalar_lea.hbm %s1512_s10, 8  ;;  %s1517_s30 = scalar_lea.hbm %s2139_s4, 16 }
 0x164   : > { %p1514_p6 = scmp.ne.s32.totalorder %s1512_s10, %s1513_s11  ;;  %p1518_p10 = scmp.lt.s32.totalorder %s1512_s10, %s2139_s4 }
 0x165   : > { %p1519_p11 = scmp.lt.s32.totalorder %s1517_s30, %s1513_s11 }
 0x166   : > { %p1515_p7 = pnand %p1514_p6, %p1648_p4 }
 0x167   : > { %p1520_p12 = por %p1519_p11, %p1518_p10 }
 0x168   : > { %p1516_p9 = pneg %p1515_p7 }
 0x16a   : > { %p1521_p13 = pnand %p1520_p12, %p1516_p9 }
 0x16c   : > { %1524 = shalt.err (!%p1521_p13)
}
 0x16d   : > { %1408 = dma.vmem_to_hbm [thread:$0]  (%p1648_p4), %s2082_s18, 128, %s2084_s14, %s997_s26  }
 0x16e PF: > { %p1418_p0 = scmp.ge.s32.totalorder %s1579_s20, 2  ;;  %s1051_s7 = sand.u32 1, %s1559_s15  }
 0x16f   : > { %s1052_s29 = scalar_lea.sflag [#allocation3], %s1051_s7 }
 0x170   : > { %p1412_p1 = pnand %p1418_p0, %p1655_p8 }
 0x172   : > { %p1413_p2 = pneg %p1412_p1 }
 0x174   : > { %1550 = dma.done.wait (%p1413_p2), %s1052_s29, 128  }
 0x175   : > { %1552 = vsyncadd (%p1413_p2), %s1052_s29, 4294967168  ;;  %s1062_s12 = scalar_lea.sflag [#allocation5], %s1051_s7 }
 0x176   : > { %1554 = dma.done.wait (%p1413_p2), %s1062_s12, 128  }
 0x177   : > { %1556 = vsyncadd (%p1413_p2), %s1062_s12, 4294967168  ;;  %s21_s20 = sadd.s32 1, %s1579_s20   ;;  %s2142_s15 = smov %s1563_s16 }
 0x178   : > { %p18_p3 = scmp.ge.s32.totalorder %s21_s20, 4   ;;  %s2143_s16 = smov %s1567_s17 }
 0x179   : > { %s2144_s17 = smov %s1661_s28  ;;  %s2145_s18 = smov %s1575_s19 }
 0x17a   : > { %s2146_s19 = smov %s2148_s23  ;;  %20 = sbr.rel (!%p18_p3) target bundleno = 6 (0x6), region = 96 }
 0x17f   :  { %1068 = vsyncpa [#allocation3], 1 }
 0x180   :  { %1070 = vsyncpa [#allocation3 + $0x1], 1 }
 0x181   :  { %1071 = vsyncpa [#allocation5], 1 }
 0x182   :  { %1073 = vsyncpa [#allocation5 + $0x1], 1 }

</bundles_post_ra>
